<compile_context>
chip_gen: v5e
topology: v5e:2x2
jax: 0.10.0
libtpu: 0.0.40
codegen_flags: <defaults>
</compile_context>

<pallas_src>
import jax
import jax.numpy as jnp
from jax.experimental import pallas as pl
from jax.experimental.pallas import tpu as pltpu

_LANES = 128


def _round_up(x: int, m: int) -> int:
    return ((x + m - 1) // m) * m


def _giou_kernel(b1_ref, b2_ref, out_ref):
    # b*_ref: (4, tile_rows, 128) coordinate-first, lane-dense over boxes.
    # Read per-coordinate planes directly to keep live ranges narrow.
    x1a, y1a, x2a, y2a = b1_ref[0], b1_ref[1], b1_ref[2], b1_ref[3]
    x1b, y1b, x2b, y2b = b2_ref[0], b2_ref[1], b2_ref[2], b2_ref[3]

    # Intersection (clamped at 0, like the reference).
    i_w = jnp.maximum(jnp.minimum(x2a, x2b) - jnp.maximum(x1a, x1b), 0.0)
    i_h = jnp.maximum(jnp.minimum(y2a, y2b) - jnp.maximum(y1a, y1b), 0.0)
    i_area = i_w * i_h

    # Individual box areas (clamped at 0, like the reference).
    area_1 = jnp.maximum((x2a - x1a) * (y2a - y1a), 0.0)
    area_2 = jnp.maximum((x2b - x1b) * (y2b - y1b), 0.0)
    union = area_1 + area_2 - i_area

    # IoU = I/union where union > 0, else 0 (matches the masked assignment).
    pos = union > 0.0
    iou = jnp.where(pos, i_area / jnp.where(pos, union, 1.0), 0.0)

    # Smallest enclosing box.
    enc_w = jnp.maximum(x2a, x2b) - jnp.minimum(x1a, x1b)
    enc_h = jnp.maximum(y2a, y2b) - jnp.minimum(y1a, y1b)
    enc_area = enc_w * enc_h

    # NOTE: reference divides by enclosure_area without a zero guard; reproduce
    # that exactly (exact divide, no approx reciprocal — compute has huge slack).
    giou = iou - (enc_area - union) / enc_area

    out_ref[...] = (1.0 - giou).astype(out_ref.dtype)


def giou_loss(boxes_1: jax.Array, boxes_2: jax.Array, *, max_tile_rows: int = 1024) -> jax.Array:
    """boxes_1, boxes_2: (B, n, 4) [x1, y1, x2, y2] -> loss (B, n) float32."""
    assert boxes_1.shape == boxes_2.shape
    B, n, four = boxes_1.shape
    assert four == 4

    total = B * n
    rows = -(-total // _LANES)  # ceil(total / 128)

    # Number of grid steps: enough to keep tiles <= max_tile_rows, at least 2
    # and even so v7x can shard the "parallel" axis across both TensorCores.
    # On single-TC chips (v5e/v6e) the extra step is ~0.35 us — negligible.
    num_steps = max(2, -(-rows // max_tile_rows))
    if num_steps % 2:
        num_steps += 1
    tile_rows = max(8, _round_up(-(-rows // num_steps), 8))
    rows_p = tile_rows * num_steps
    total_p = rows_p * _LANES

    def to_slab(b):
        b = b.astype(jnp.float32).reshape(total, 4)
        if total_p != total:
            b = jnp.pad(b, ((0, total_p - total), (0, 0)))
        # coordinate-first, lane-dense slab: (4, rows_p, 128)
        return b.T.reshape(4, rows_p, _LANES)

    b1 = to_slab(boxes_1)
    b2 = to_slab(boxes_2)

    grid = (num_steps,)
    in_spec = pl.BlockSpec((4, tile_rows, _LANES), lambda i: (0, i, 0))
    out_spec = pl.BlockSpec((tile_rows, _LANES), lambda i: (i, 0))

    out = pl.pallas_call(
        _giou_kernel,
        out_shape=jax.ShapeDtypeStruct((rows_p, _LANES), jnp.float32),
        grid_spec=pltpu.PrefetchScalarGridSpec(
            num_scalar_prefetch=0,
            grid=grid,
            in_specs=[in_spec, in_spec],
            out_specs=out_spec,
        ),
        compiler_params=pltpu.CompilerParams(
            dimension_semantics=("parallel",),
            # 1024-row tiles need ~9 MiB double-buffered; set the scoped VMEM
            # limit explicitly so we do not depend on per-chip defaults
            # (v5e default is 16 MiB; v6e/v7x default 32 MiB).
            vmem_limit_bytes=32 * 1024 * 1024,
            # Let XLA fuse the layout change (pad/transpose) into the input
            # DMAs instead of materializing an extra HBM copy.
            allow_input_fusion=[True, True],
        ),
    )(b1, b2)

    return out.reshape(total_p)[:total].reshape(B, n)


def _giou_loss_ref(boxes_1, boxes_2):
    """Pure-JAX reference mirroring the PyTorch module."""
    x1a, y1a, x2a, y2a = (boxes_1[..., k] for k in range(4))
    x1b, y1b, x2b, y2b = (boxes_2[..., k] for k in range(4))
    i_w = jnp.maximum(jnp.minimum(x2a, x2b) - jnp.maximum(x1a, x1b), 0.0)
    i_h = jnp.maximum(jnp.minimum(y2a, y2b) - jnp.maximum(y1a, y1b), 0.0)
    i_area = i_w * i_h
    a1 = jnp.maximum((x2a - x1a) * (y2a - y1a), 0.0)
    a2 = jnp.maximum((x2b - x1b) * (y2b - y1b), 0.0)
    union = a1 + a2 - i_area
    pos = union > 0.0
    iou = jnp.where(pos, i_area / jnp.where(pos, union, 1.0), 0.0)
    enc = (jnp.maximum(x2a, x2b) - jnp.minimum(x1a, x1b)) * (
        jnp.maximum(y2a, y2b) - jnp.minimum(y1a, y1b))
    giou = iou - (enc - union) / enc
    return 1.0 - giou


if __name__ == "__main__":
    key = jax.random.PRNGKey(0)
    B, n = 2, 1000  # non-multiple of 128: exercises padding + a 2-step grid

    def make_boxes(k):
        kc, ks = jax.random.split(k)
        centers = jax.random.uniform(kc, (B, n, 2), minval=0.0, maxval=32.0)
        sizes = jax.random.uniform(ks, (B, n, 2), minval=0.5, maxval=8.0)
        x1y1 = centers - 0.5 * sizes
        x2y2 = centers + 0.5 * sizes
        return jnp.concatenate([x1y1, x2y2], axis=-1).astype(jnp.float32)

    k1, k2 = jax.random.split(key)
    boxes_1 = make_boxes(k1)
    boxes_2 = make_boxes(k2)

    out = giou_loss(boxes_1, boxes_2)
    out = jax.block_until_ready(out)

    ref = _giou_loss_ref(boxes_1, boxes_2)
    assert out.shape == (B, n)
    assert jnp.allclose(out, ref, atol=1e-5, rtol=1e-5)

    print("KERNEL_OK")
</pallas_src>

<mosaic_0001>
module attributes {stable_mosaic.version = 11 : i64} {
  func.func @_giou_kernel(%arg0: i32, %arg1: memref<4x8x128xf32, #tpu.memory_space<vmem>>, %arg2: memref<4x8x128xf32, #tpu.memory_space<vmem>>, %arg3: memref<8x128xf32, #tpu.memory_space<vmem>>) attributes {dimension_semantics = [#tpu.dimension_semantics<parallel>], iteration_bounds = array<i64: 2>, scalar_prefetch = 0 : i64, scratch_operands = 0 : i64, tpu.core_type = #tpu.core_type<tc>, window_params = [{transform_indices = @transform_0, window_bounds = array<i64: 4, 8, 128>}, {transform_indices = @transform_1, window_bounds = array<i64: 4, 8, 128>}, {transform_indices = @transform_2, window_bounds = array<i64: 8, 128>}]} {
    %c0 = arith.constant 0 : index
    %c0_0 = arith.constant 0 : index
    %c0_1 = arith.constant 0 : index
    %0 = vector.load %arg1[%c0, %c0_0, %c0_1] : memref<4x8x128xf32, #tpu.memory_space<vmem>>, vector<1x8x128xf32>
    %1 = vector.shape_cast %0 : vector<1x8x128xf32> to vector<8x128xf32>
    %c1 = arith.constant 1 : index
    %c0_2 = arith.constant 0 : index
    %c0_3 = arith.constant 0 : index
    %2 = vector.load %arg1[%c1, %c0_2, %c0_3] : memref<4x8x128xf32, #tpu.memory_space<vmem>>, vector<1x8x128xf32>
    %3 = vector.shape_cast %2 : vector<1x8x128xf32> to vector<8x128xf32>
    %c2 = arith.constant 2 : index
    %c0_4 = arith.constant 0 : index
    %c0_5 = arith.constant 0 : index
    %4 = vector.load %arg1[%c2, %c0_4, %c0_5] : memref<4x8x128xf32, #tpu.memory_space<vmem>>, vector<1x8x128xf32>
    %5 = vector.shape_cast %4 : vector<1x8x128xf32> to vector<8x128xf32>
    %c3 = arith.constant 3 : index
    %c0_6 = arith.constant 0 : index
    %c0_7 = arith.constant 0 : index
    %6 = vector.load %arg1[%c3, %c0_6, %c0_7] : memref<4x8x128xf32, #tpu.memory_space<vmem>>, vector<1x8x128xf32>
    %7 = vector.shape_cast %6 : vector<1x8x128xf32> to vector<8x128xf32>
    %c0_8 = arith.constant 0 : index
    %c0_9 = arith.constant 0 : index
    %c0_10 = arith.constant 0 : index
    %8 = vector.load %arg2[%c0_8, %c0_9, %c0_10] : memref<4x8x128xf32, #tpu.memory_space<vmem>>, vector<1x8x128xf32>
    %9 = vector.shape_cast %8 : vector<1x8x128xf32> to vector<8x128xf32>
    %c1_11 = arith.constant 1 : index
    %c0_12 = arith.constant 0 : index
    %c0_13 = arith.constant 0 : index
    %10 = vector.load %arg2[%c1_11, %c0_12, %c0_13] : memref<4x8x128xf32, #tpu.memory_space<vmem>>, vector<1x8x128xf32>
    %11 = vector.shape_cast %10 : vector<1x8x128xf32> to vector<8x128xf32>
    %c2_14 = arith.constant 2 : index
    %c0_15 = arith.constant 0 : index
    %c0_16 = arith.constant 0 : index
    %12 = vector.load %arg2[%c2_14, %c0_15, %c0_16] : memref<4x8x128xf32, #tpu.memory_space<vmem>>, vector<1x8x128xf32>
    %13 = vector.shape_cast %12 : vector<1x8x128xf32> to vector<8x128xf32>
    %c3_17 = arith.constant 3 : index
    %c0_18 = arith.constant 0 : index
    %c0_19 = arith.constant 0 : index
    %14 = vector.load %arg2[%c3_17, %c0_18, %c0_19] : memref<4x8x128xf32, #tpu.memory_space<vmem>>, vector<1x8x128xf32>
    %15 = vector.shape_cast %14 : vector<1x8x128xf32> to vector<8x128xf32>
    %16 = arith.minimumf %5, %13 : vector<8x128xf32>
    %17 = arith.maximumf %1, %9 : vector<8x128xf32>
    %18 = arith.subf %16, %17 : vector<8x128xf32>
    %cst = arith.constant 0.000000e+00 : f32
    %19 = vector.broadcast %cst : f32 to vector<8x128xf32>
    %20 = arith.maximumf %18, %19 : vector<8x128xf32>
    %21 = arith.minimumf %7, %15 : vector<8x128xf32>
    %22 = arith.maximumf %3, %11 : vector<8x128xf32>
    %23 = arith.subf %21, %22 : vector<8x128xf32>
    %cst_20 = arith.constant 0.000000e+00 : f32
    %24 = vector.broadcast %cst_20 : f32 to vector<8x128xf32>
    %25 = arith.maximumf %23, %24 : vector<8x128xf32>
    %26 = arith.mulf %20, %25 : vector<8x128xf32>
    %27 = arith.subf %5, %1 : vector<8x128xf32>
    %28 = arith.subf %7, %3 : vector<8x128xf32>
    %29 = arith.mulf %27, %28 : vector<8x128xf32>
    %cst_21 = arith.constant 0.000000e+00 : f32
    %30 = vector.broadcast %cst_21 : f32 to vector<8x128xf32>
    %31 = arith.maximumf %29, %30 : vector<8x128xf32>
    %32 = arith.subf %13, %9 : vector<8x128xf32>
    %33 = arith.subf %15, %11 : vector<8x128xf32>
    %34 = arith.mulf %32, %33 : vector<8x128xf32>
    %cst_22 = arith.constant 0.000000e+00 : f32
    %35 = vector.broadcast %cst_22 : f32 to vector<8x128xf32>
    %36 = arith.maximumf %34, %35 : vector<8x128xf32>
    %37 = arith.addf %31, %36 : vector<8x128xf32>
    %38 = arith.subf %37, %26 : vector<8x128xf32>
    %cst_23 = arith.constant 0.000000e+00 : f32
    %39 = vector.broadcast %cst_23 : f32 to vector<8x128xf32>
    %40 = arith.cmpf ogt, %38, %39 : vector<8x128xf32>
    %cst_24 = arith.constant 1.000000e+00 : f32
    %41 = vector.broadcast %cst_24 : f32 to vector<8x128xf32>
    %42 = arith.select %40, %38, %41 : vector<8x128xi1>, vector<8x128xf32>
    %43 = arith.divf %26, %42 : vector<8x128xf32>
    %cst_25 = arith.constant 0.000000e+00 : f32
    %44 = vector.broadcast %cst_25 : f32 to vector<8x128xf32>
    %45 = arith.select %40, %43, %44 : vector<8x128xi1>, vector<8x128xf32>
    %46 = arith.maximumf %5, %13 : vector<8x128xf32>
    %47 = arith.minimumf %1, %9 : vector<8x128xf32>
    %48 = arith.subf %46, %47 : vector<8x128xf32>
    %49 = arith.maximumf %7, %15 : vector<8x128xf32>
    %50 = arith.minimumf %3, %11 : vector<8x128xf32>
    %51 = arith.subf %49, %50 : vector<8x128xf32>
    %52 = arith.mulf %48, %51 : vector<8x128xf32>
    %53 = arith.subf %52, %38 : vector<8x128xf32>
    %54 = arith.divf %53, %52 : vector<8x128xf32>
    %55 = arith.subf %45, %54 : vector<8x128xf32>
    %cst_26 = arith.constant 1.000000e+00 : f32
    %56 = vector.broadcast %cst_26 : f32 to vector<8x128xf32>
    %57 = arith.subf %56, %55 : vector<8x128xf32>
    %c0_27 = arith.constant 0 : index
    %c0_28 = arith.constant 0 : index
    %58 = vector.load %arg3[%c0_27, %c0_28] : memref<8x128xf32, #tpu.memory_space<vmem>>, vector<8x128xf32>
    tpu.vector_store %arg3[%c0_27, %c0_28], %57 {strides = array<i32>} : memref<8x128xf32, #tpu.memory_space<vmem>>, vector<8x128xf32>,
    return
  }
  func.func @transform_0(%arg0: i32) -> (i32, i32, i32) {
    %c0_i32 = arith.constant 0 : i32
    %c0_i32_0 = arith.constant 0 : i32
    %c0_i32_1 = arith.constant 0 : i32
    return %c0_i32, %arg0, %c0_i32_0 : i32, i32, i32
  }
  func.func @transform_1(%arg0: i32) -> (i32, i32, i32) {
    %c0_i32 = arith.constant 0 : i32
    %c0_i32_0 = arith.constant 0 : i32
    %c0_i32_1 = arith.constant 0 : i32
    return %c0_i32, %arg0, %c0_i32_0 : i32, i32, i32
  }
  func.func @transform_2(%arg0: i32) -> (i32, i32) {
    %c0_i32 = arith.constant 0 : i32
    %c0_i32_0 = arith.constant 0 : i32
    return %arg0, %c0_i32 : i32, i32
  }
}

</mosaic_0001>

<bundles_post_ra>
// kernel: tpu_custom_call.1
= control target key start
LH: loop header
LB: loop body
LE: loop exit
PB: predicated region body
PF: predicated region fallthrough
CT: control target
= control target key end

     0   :  { %s796_s0 = inlined_call_operand.hbm [shape: f32[4,16,128], index: 0, kind: input, shape index: {}]   ;;  %s797_s1 = inlined_call_operand.hbm [shape: f32[4,16,128], index: 1, kind: input, shape index: {}]   ;;  %s798_s2 = inlined_call_operand.hbm [shape: f32[16,128], index: 2, kind: output, shape index: {}]  }
   0x1   :  { %799 = sst [smem:[#allocation11_spill]] %s796_s0 }
   0x2   :  { %7 = vsyncpa [#allocation3], 0 }
   0x3   :  { %9 = vsyncpa [#allocation3 + $0x1], 0 }
   0x4   :  { %10 = vsyncpa [#allocation6], 0 }
   0x5   :  { %12 = vsyncpa [#allocation6 + $0x1], 0 }
   0x6   :  { %13 = vsyncpa [#allocation4], 0 }
   0x7   :  { %15 = vsyncpa [#allocation4 + $0x1], 0  ;;  %s619_s9 = smov 0   ;;  %s621_s10 = smov 0  }
   0x8   :  { %s623_s11 = smov 0   ;;  %s625_s12 = smov 0  }
   0x9 LB: > { %s640_s13 = sadd.s32 4294967295, %s599_s12   ;;  %s390_s14 = sadd.s32 4294967294, %s599_s12   ;;  %s599_s12 = sphi %s625_s12, %s812_s12   ;;  %s595_s11 = sphi %s623_s11, %s811_s11   ;;  %s591_s10 = sphi %s621_s10, %s810_s10   ;;  %s587_s9 = sphi %s619_s9, %s809_s9  }
   0xa   : > { %s644_s15 = sadd.s32 1, %s599_s12   ;;  %s28_s16 = sadd.s32 1, %s595_s11 }
   0xb   : > { %s25_s17 = ssub.s32 %s599_s12, %s644_s15  ;;  %p35_p0 = scmp.ne.s32.totalorder %s595_s11, %s591_s10 }
   0xc   : > { %p26_p1 = scmp.eq.s32.totalorder %s25_s17, 0  ;;  %p36_p2 = scmp.eq.s32.totalorder %s599_s12, 0 }
   0xd   : > { %p41_p3 = scmp.ne.s32.totalorder %s591_s10, %s587_s9  ;;  %p42_p4 = scmp.eq.s32.totalorder %s640_s13, 0 }
   0xe   : > { %s656_s18 = scalar_select %p26_p1, %s595_s11, %s28_s16  }
   0xf   : > { %p658_p5 = por %p36_p2, %p35_p0  ;;  %p662_p6 = por %p42_p4, %p41_p3 }
  0x10   : > { %p91_p7 = scmp.eq.s32.totalorder %s640_s13, 1  ;;  %p97_p8 = scmp.eq.s32.totalorder %s390_s14, 1 }
  0x11   : > { %p392_p9 = scmp.ge.s32.totalorder %s599_s12, 2  ;;  %p428_p10 = scmp.lt.s32.totalorder %s599_s12, 2 }
  0x12   : > { %p669_p11 = por %p91_p7, %p35_p0  ;;  %p673_p12 = por %p97_p8, %p41_p3 }
  0x13   : > { %s678_s23 = sand.u32 1, %s595_s11   ;;  %s394_s24 = sshll.u32 %s599_s12, 3 }
  0x14   : > { %s393_s25 = sshll.u32 %s678_s23, 5  ;;  %s804_s0 = sld [smem:[#allocation11_spill]] }
  0x15   : > { %s121_s30 = scalar_lea.vmem [#allocation2], %s393_s25  ;;  %p691_p13 = pnand %p428_p10, %p658_p5 }
  0x16   : > { %s128_s3 = sshll.u32 %s121_s30, 4  ;;  %p397_p0 = scmp.ge.s32.totalorder %s599_s12, 1  ;;  %s129_s3 = int_to_ptr.vmem [resolvable:$true] %s128_s3 }
  0x17   : > { %s118_s5 = scalar_lea.sflag [#allocation3], %s678_s23  ;;  %p473_p2 = pneg %p691_p13 }
  0x1a   : > { %s125_s28 = scalar_lea.hbm %s804_s0, %s394_s24  ;;  %s476_s16 = scalar_lea.hbm %s804_s0, 64 }
  0x1b   : > { %s126_s29 = sshll.u32 %s125_s28, 4  ;;  %s127_s29 = int_to_ptr.hbm [resolvable:$true] %s126_s29 }
  0x1c   : > { %s469_s6 = sshra.s32 %s127_s29, 4  ;;  %s470_s6 = int_to_ptr.hbm [resolvable:$true] %s469_s6 }
  0x1d   : > { %s471_s7 = scalar_lea.hbm %s470_s6, 32  ;;  %p477_p5 = scmp.lt.s32.totalorder %s470_s6, %s804_s0 }
  0x1e   : > { %p472_p1 = scmp.ne.s32.totalorder %s470_s6, %s471_s7  ;;  %p478_p7 = scmp.lt.s32.totalorder %s476_s16, %s471_s7 }
  0x20   : > { %p474_p3 = pnand %p473_p2, %p472_p1  ;;  %p479_p8 = por %p478_p7, %p477_p5 }
  0x22   : > { %p475_p4 = pneg %p474_p3 }
  0x24   : > { %p480_p10 = pnand %p479_p8, %p475_p4 }
  0x26   : > { %483 = shalt.err (!%p480_p10)
}
  0x27   : > { %s601_s26 = smov 256   ;;  %s602_s27 = smov 128  }
  0x28   : > { %s603_s28 = smov 8   ;;  %p157_p1 = scmp.lt.s32.totalorder %s599_s12, 3 }
  0x29   : > { %420 = dma.hbm_to_vmem [thread:$0]  (!%p691_p13), %s127_s29, 512, %s129_s3, %s118_s5, %s601_s26, %s602_s27, %s603_s28  }
  0x2a   : > { %s146_s7 = scalar_lea.hbm %s797_s1, %s394_s24  ;;  %p719_p3 = pnand %p397_p0, %p157_p1 }
  0x2b   : > { %s147_s14 = sshll.u32 %s146_s7, 4  ;;  %s142_s16 = scalar_lea.vmem [#allocation5], %s393_s25  ;;  %s148_s14 = int_to_ptr.hbm [resolvable:$true] %s147_s14 }
  0x2c   : > { %s149_s17 = sshll.u32 %s142_s16, 4  ;;  %s139_s19 = scalar_lea.sflag [#allocation6], %s678_s23  ;;  %s150_s17 = int_to_ptr.vmem [resolvable:$true] %s149_s17 }
  0x2d   : > { %s499_s0 = sshra.s32 %s148_s14, 4  ;;  %s506_s5 = scalar_lea.hbm %s797_s1, 64  ;;  %s500_s0 = int_to_ptr.hbm [resolvable:$true] %s499_s0 }
  0x2e   : > { %s501_s29 = scalar_lea.hbm %s500_s0, 32  ;;  %p507_p0 = scmp.lt.s32.totalorder %s500_s0, %s797_s1 }
  0x2f   : > { %p502_p4 = scmp.ne.s32.totalorder %s500_s0, %s501_s29  ;;  %p508_p8 = scmp.lt.s32.totalorder %s506_s5, %s501_s29 }
  0x31   : > { %p504_p5 = pnand %p502_p4, %p473_p2  ;;  %p509_p10 = por %p508_p8, %p507_p0 }
  0x33   : > { %p505_p7 = pneg %p504_p5 }
  0x35   : > { %p510_p1 = pnand %p509_p10, %p505_p7 }
  0x37   : > { %513 = shalt.err (!%p510_p1)
}
  0x38   : > { %423 = dma.hbm_to_vmem [thread:$0]  (!%p691_p13), %s148_s14, 512, %s150_s17, %s139_s19, %s601_s26, %s602_s27, %s603_s28  }
  0x39   : > { %161 = sbr.rel (%p719_p3) target bundleno = 108 (0x6c), region = 28  ;;  %s741_s23 = sand.u32 (!%p719_p3), 1, %s591_s10  }
  0x3a   : > { %s398_s25 = sshll.u32 (!%p719_p3), %s741_s23, 5  ;;  %s164_s7 = scalar_lea.sflag (!%p719_p3), [#allocation3], %s741_s23 }
  0x3b   : > { %s167_s0 = scalar_lea.vmem (!%p719_p3), [#allocation2], %s398_s25 }
  0x3e   : > { %574 = dma.done.wait (%p662_p6), %s164_s7, 512  }
  0x3f   : > { %576 = vsyncadd (%p662_p6), %s164_s7, 4294966784  ;;  %s174_s4 = scalar_lea.sflag [#allocation6], %s741_s23  ;;  %s177_s26 = scalar_lea.vmem [#allocation5], %s398_s25 }
  0x40   : > { %578 = dma.done.wait (%p662_p6), %s174_s4, 512  }
  0x41   : > { %580 = vsyncadd (%p662_p6), %s174_s4, 4294966784  ;;  %v204_v0 = vld [vmem:[%s167_s0] sm:$0xff]  ;;  %v401_v1 = vld [vmem:[%s167_s0 + $0x8] sm:$0xff]  ;;  %s400_s20 = sshll.u32 %s741_s23, 3  ;;  %s408_s27 = sshll.u32 %s640_s13, 3 }
  0x42   : > { %v402_v2 = vld [vmem:[%s167_s0 + $0x10] sm:$0xff]  ;;  %v403_v3 = vld [vmem:[%s167_s0 + $0x18] sm:$0xff]  ;;  %v211_v4 = vld [vmem:[%s177_s26] sm:$0xff]  ;;  %s292_s14 = scalar_lea.hbm %s798_s2, %s408_s27  ;;  %s203_s16 = scalar_lea.vmem [#allocation7], %s400_s20 }
  0x43   : > { %v404_v5 = vld [vmem:[%s177_s26 + $0x8] sm:$0xff]  ;;  %v227_v6 = vsub.f32 %v402_v2, %v204_v0  ;;  %v405_v7 = vld [vmem:[%s177_s26 + $0x10] sm:$0xff]  ;;  %v406_v8 = vld [vmem:[%s177_s26 + $0x18] sm:$0xff]  ;;  %v219_v9 = vmax.f32 %v204_v0, %v211_v4  ;;  %v228_v11 = vsub.f32 %v403_v3, %v401_v1  ;;  %v256_v12 = vmin.f32 %v204_v0, %v211_v4  ;;  %s294_s17 = sshll.u32 %s203_s16, 4  ;;  %s296_s19 = sshll.u32 %s292_s14, 4  ;;  %s295_s17 = int_to_ptr.vmem [resolvable:$true] %s294_s17  ;;  %s297_s19 = int_to_ptr.hbm [resolvable:$true] %s296_s19 }
  0x44   : > { %v223_v10 = vmax.f32 %v401_v1, %v404_v5  ;;  %v218_v13 = vmin.f32 %v402_v2, %v405_v7  ;;  %v222_v14 = vmin.f32 %v403_v3, %v406_v8  ;;  %v231_v15 = vsub.f32 %v405_v7, %v211_v4  ;;  %s282_s13 = scalar_lea.sflag [#allocation4], %s741_s23  ;;  %s543_s29 = sshra.s32 %s297_s19, 4  ;;  %s544_s29 = int_to_ptr.hbm [resolvable:$true] %s543_s29 }
  0x45   : > { %v232_v16 = vsub.f32 %v406_v8, %v404_v5  ;;  %v229_v17 = vmul.f32 %v228_v11, %v227_v6  ;;  %v255_v18 = vmax.f32 %v402_v2, %v405_v7  ;;  %v258_v19 = vmax.f32 %v403_v3, %v406_v8  ;;  %s545_s24 = scalar_lea.hbm %s544_s29, 8  ;;  %s549_s30 = scalar_lea.hbm %s798_s2, 16 }
  0x46   : > { %v259_v20 = vmin.f32 %v401_v1, %v404_v5  ;;  %v220_v21 = vsub.f32 %v218_v13, %v219_v9  ;;  %v224_v22 = vsub.f32 %v222_v14, %v223_v10  ;;  %p546_p6 = scmp.ne.s32.totalorder %s544_s29, %s545_s24  ;;  %p550_p3 = scmp.lt.s32.totalorder %s544_s29, %s798_s2 }
  0x47   : > { %v233_v23 = vmul.f32 %v232_v16, %v231_v15  ;;  %v230_v24 = vmax.f32 %v229_v17, 0.0  ;;  %v257_v25 = vsub.f32 %v255_v18, %v256_v12  ;;  %p551_p4 = scmp.lt.s32.totalorder %s549_s30, %s545_s24 }
  0x48   : > { %v260_v26 = vsub.f32 %v258_v19, %v259_v20  ;;  %v221_v27 = vmax.f32 %v220_v21, 0.0  ;;  %v225_v28 = vmax.f32 %v224_v22, 0.0  ;;  %p547_p13 = pnand %p546_p6, %p669_p11 }
  0x49   : > { %v234_v29 = vmax.f32 %v233_v23, 0.0  ;;  %p552_p5 = por %p551_p4, %p550_p3 }
  0x4a   : > { %v261_v30 = vmul.f32 %v260_v26, %v257_v25  ;;  %v226_v31 = vmul.f32 %v225_v28, %v221_v27  ;;  %p548_p2 = pneg %p547_p13 }
  0x4b   : > { %v235_v32 = vadd.f32 %v234_v29, %v230_v24 }
  0x4c   : > { %465 = vrcp.f32 %v261_v30  ;;  %vm268_vm1 = vweird.f32 %v261_v30  ;;  %v274_v38 = vand.u32 2147483648, %v261_v30  ;;  %v272_v41 = vand.u32 2147483647, %v261_v30  ;;  %p553_p7 = pnand %p552_p5, %p548_p2 }
  0x4d   : > { %v236_v33 = vsub.f32 %v235_v32, %v226_v31 }
  0x4e   : > { %v275_v46 = vor.u32 1.1754944e-38, %v274_v38  ;;  %vm273_vm6 = vcmp.eq.f32.partialorder %v272_v41, 8.507059e+37 }
  0x4f   : > { %vm237_vm0 = vcmp.gt.f32.partialorder %v236_v33, 0.0  ;;  %v262_v52 = vsub.f32 %v261_v30, %v236_v33 }
  0x50   : > { %v238_v34 = vsel %vm237_vm0, %v236_v33, 1.0 }
  0x51   : > { %467 = vrcp.f32 %v238_v34  ;;  %v250_v44 = vand.u32 2147483648, %v238_v34  ;;  %vm244_vm4 = vweird.f32 %v238_v34  ;;  %v248_v48 = vand.u32 2147483647, %v238_v34 }
  0x52   : > { %v466_v35 = vpop.eup %465 }
  0x53   : > { %v264_v36 = vmul.f32 %v466_v35, %v261_v30  ;;  %vm269_vm2 = vweird.f32 %v466_v35  ;;  %v251_v51 = vor.u32 1.1754944e-38, %v250_v44  ;;  %vm249_vm8 = vcmp.eq.f32.partialorder %v248_v48, 8.507059e+37 }
  0x54   : > { %vm755_vm3 = vmor %vm268_vm1, %vm269_vm2 }
  0x55   : > { %v265_v37 = vsub.f32 1.0, %v264_v36 }
  0x57   : > { %v468_v39 = vpop.eup %467  ;;  %v266_v40 = vmul.f32 %v466_v35, %v265_v37 }
  0x58   : > { %v240_v42 = vmul.f32 %v468_v39, %v238_v34  ;;  %vm245_vm5 = vweird.f32 %v468_v39 }
  0x59   : > { %v267_v45 = vadd.f32 %v466_v35, %v266_v40  ;;  %vm246_vm7 = vmor %vm244_vm4, %vm245_vm5 }
  0x5a   : > { %v241_v47 = vsub.f32 1.0, %v240_v42 }
  0x5b   : > { %v271_v49 = vsel %vm755_vm3, %v466_v35, %v267_v45 }
  0x5c   : > { %v242_v50 = vmul.f32 %v468_v39, %v241_v47  ;;  %v276_v54 = vsel %vm273_vm6, %v275_v46, %v271_v49 }
  0x5d   : > { %v277_v57 = vmul.f32 %v276_v54, %v262_v52 }
  0x5e   : > { %v243_v53 = vadd.f32 %v468_v39, %v242_v50 }
  0x60   : > { %v247_v55 = vsel %vm246_vm7, %v468_v39, %v243_v53 }
  0x61   : > { %v252_v56 = vsel %vm249_vm8, %v251_v51, %v247_v55 }
  0x62   : > { %v253_v58 = vmul.f32 %v252_v56, %v226_v31 }
  0x64   : > { %v254_v59 = vsel %vm237_vm0, %v253_v58, 0.0 }
  0x65   : > { %v278_v60 = vsub.f32 %v254_v59, %v277_v57 }
  0x67   : > { %v279_v61 = vsub.f32 1.0, %v278_v60 }
  0x69   : > { %280 = vst [vmem:[%s203_s16] sm:$0xff] %v279_v61 }
  0x6a   : > { %556 = shalt.err (!%p553_p7)
}
  0x6b   : > { %415 = dma.vmem_to_hbm [thread:$0]  (%p669_p11), %s295_s17, 128, %s297_s19, %s282_s13  }
  0x6c PF: > { %s308_s23 = sand.u32 1, %s587_s9   ;;  %p425_p0 = pnand %p392_p9, %p673_p12 }
  0x6d   : > { %s309_s7 = scalar_lea.sflag [#allocation4], %s308_s23 }
  0x6e   : > { %p426_p8 = pneg %p425_p0 }
  0x70   : > { %582 = dma.done.wait (%p426_p8), %s309_s7, 128  }
  0x71   : > { %584 = vsyncadd (%p426_p8), %s309_s7, 4294967168  ;;  %p18_p10 = scmp.ge.s32.totalorder %s644_s15, 4   ;;  %s809_s9 = smov %s591_s10 }
  0x72   : > { %s810_s10 = smov %s595_s11  ;;  %s811_s11 = smov %s656_s18 }
  0x73   : > { %s812_s12 = smov %s644_s15  ;;  %20 = sbr.rel (!%p18_p10) target bundleno = 9 (0x9), region = 92 }
  0x78   :  { %315 = vsyncpa [#allocation3], 1 }
  0x79   :  { %317 = vsyncpa [#allocation3 + $0x1], 1 }
  0x7a   :  { %318 = vsyncpa [#allocation6], 1 }
  0x7b   :  { %320 = vsyncpa [#allocation6 + $0x1], 1 }
  0x7c   :  { %321 = vsyncpa [#allocation4], 1 }
  0x7d   :  { %323 = vsyncpa [#allocation4 + $0x1], 1 }

</bundles_post_ra>
